<compile_context>
chip_gen: v5e
topology: v5e:2x2
jax: 0.10.0
libtpu: 0.0.40
codegen_flags: <defaults>
</compile_context>

<pallas_src>
import jax
import jax.numpy as jnp
from jax.experimental import pallas as pl
from jax.experimental.pallas import tpu as pltpu


def _round_up(x, m):
    return (x + m - 1) // m * m


def _cdiv(a, b):
    return -(-a // b)


def _choose_tm(M, cap=1024):
    """Pick an M tile: multiple of 128, <= cap, aiming for an even (>=2) tile count.

    Even tile count keeps both v7x TensorCores busy when the single M grid axis
    is marked "parallel"; a tight tile avoids pushing padded rows through the
    MXU.  cap=1024 amortizes per-grid-step overhead on v6e/v5e while keeping the
    double-buffered tile footprint small.
    """
    if M <= 128:
        return 128
    n_tiles = max(2, 2 * _cdiv(M, 2 * cap))          # even, >= 2
    return min(cap, _round_up(_cdiv(M, n_tiles), 128))


# ---------------------------------------------------------------------------
# Pallas kernel: one (tm, K) bf16 tile @ resident (K, D) bf16 weight + bias
# ---------------------------------------------------------------------------
def _proj_kernel(p_ref, w_ref, b_ref, o_ref):
    # Single-shot K contraction (no reduction grid axis, no accumulator
    # scratch); f32 accumulate + f32 bias, one cast at the lane-dense store.
    acc = jnp.dot(p_ref[...], w_ref[...], preferred_element_type=jnp.float32)
    o_ref[...] = (acc + b_ref[...]).astype(o_ref.dtype)


def _proj_matmul(patches, weight, bias, *, tm=None, out_dtype=jnp.bfloat16):
    """patches (M,K) bf16 @ weight (K,D) bf16 + bias (D,) f32 -> (M,D) out_dtype."""
    M, K = patches.shape
    Kw, D = weight.shape
    assert K == Kw, (K, Kw)

    Kp = _round_up(K, 128)
    Dp = _round_up(D, 128)            # lane-dense, unmasked output stores
    if tm is None:
        tm = _choose_tm(M)
    Mp = _round_up(M, tm)
    n_tiles = Mp // tm

    if Mp != M or Kp != K:
        patches = jnp.pad(patches, ((0, Mp - M), (0, Kp - K)))
    if Kp != K or Dp != D:
        weight = jnp.pad(weight, ((0, Kp - K), (0, Dp - D)))
    bias2d = jnp.pad(bias.astype(jnp.float32).reshape(1, D), ((0, 0), (0, Dp - D)))

    out_bytes = jnp.dtype(out_dtype).itemsize

    # Advisory cost so XLA overlaps the surrounding im2col/reshape with the call.
    cost = pl.CostEstimate(
        flops=2 * Mp * Kp * Dp,
        transcendentals=0,
        bytes_accessed=Mp * Kp * 2 + Kp * Dp * 2 + Dp * 4 + Mp * Dp * out_bytes,
    )

    # Actual tile footprint: double-buffered streamed patch + out tiles,
    # double-buffered (grid-invariant, fetched once) weight and bias.
    vmem_bytes = (2 * tm * Kp * 2 + 2 * tm * Dp * out_bytes
                  + 2 * Kp * Dp * 2 + 2 * Dp * 4)
    vmem_limit = int(max(vmem_bytes + (4 << 20), 32 << 20))

    out = pl.pallas_call(
        _proj_kernel,
        out_shape=jax.ShapeDtypeStruct((Mp, Dp), out_dtype),
        grid_spec=pltpu.PrefetchScalarGridSpec(
            num_scalar_prefetch=0,
            grid=(n_tiles,),
            in_specs=[
                # streamed (tm, K) patch tile
                pl.BlockSpec((tm, Kp), lambda i: (i, 0)),
                # whole weight, grid-invariant -> DMA'd once, stays resident
                pl.BlockSpec((Kp, Dp), lambda i: (0, 0)),
                # bias, grid-invariant
                pl.BlockSpec((1, Dp), lambda i: (0, 0)),
            ],
            out_specs=pl.BlockSpec((tm, Dp), lambda i: (i, 0)),
        ),
        compiler_params=pltpu.CompilerParams(
            dimension_semantics=("parallel",),   # M tiles split across v7x's 2 TCs
            vmem_limit_bytes=vmem_limit,
        ),
        cost_estimate=cost,
    )(patches, weight, bias2d)

    return out[:M, :D]


# ---------------------------------------------------------------------------
# PatchEmbed module (Conv3d path, conv_2d=False)
# ---------------------------------------------------------------------------
class PatchEmbed:
    def __init__(
        self,
        dim_in=3,
        dim_out=768,
        kernel=(1, 16, 16),
        stride=(1, 4, 4),
        padding=(1, 7, 7),
        conv_2d=False,
        out_dtype=jnp.bfloat16,
        key=None,
    ):
        assert not conv_2d, "Only the Conv3d path is implemented here."
        self.dim_in = dim_in
        self.dim_out = dim_out
        self.kernel = tuple(kernel)
        self.stride = tuple(stride)
        self.padding = tuple(padding)
        self.out_dtype = out_dtype

        # Deterministic parameter init (PyTorch Conv3d-style uniform bounds).
        if key is None:
            key = jax.random.PRNGKey(0)
        kw, kb = jax.random.split(key)
        fan_in = dim_in * kernel[0] * kernel[1] * kernel[2]
        bound = 1.0 / jnp.sqrt(jnp.float32(fan_in))
        self.weight = jax.random.uniform(
            kw, (dim_out, dim_in) + self.kernel, jnp.float32, -bound, bound
        )
        self.bias = jax.random.uniform(kb, (dim_out,), jnp.float32, -bound, bound)

    def _im2col(self, x):
        """x (N,C,T,H,W) -> patches (N*T'*H'*W', C*kT*kH*kW), plus out dims."""
        N, C, T, H, W = x.shape
        kT, kH, kW = self.kernel
        sT, sH, sW = self.stride
        pT, pH, pW = self.padding
        To = (T + 2 * pT - kT) // sT + 1
        Ho = (H + 2 * pH - kH) // sH + 1
        Wo = (W + 2 * pW - kW) // sW + 1
        K = C * kT * kH * kW

        # Fast path: non-overlapping, unpadded patches are a pure reshape.
        if (
            self.kernel == self.stride
            and self.padding == (0, 0, 0)
            and T % kT == 0 and H % kH == 0 and W % kW == 0
        ):
            xr = x.reshape(N, C, To, kT, Ho, kH, Wo, kW)
            patches = jnp.transpose(xr, (0, 2, 4, 6, 1, 3, 5, 7))
            return patches.reshape(N * To * Ho * Wo, K), (N, To, Ho, Wo)

        # Overlapping / padded path: grouped identity-kernel conv == im2col.
        # Lowers to strided copies instead of a general gather.  Feature
        # ordering of the result is (C, kT, kH, kW), matching the PyTorch
        # weight.reshape(D, -1) flattening; output layout is requested
        # channels-last so no separate transpose pass is needed.
        patches = jax.lax.conv_general_dilated_patches(
            x,
            filter_shape=self.kernel,
            window_strides=self.stride,
            padding=[(pT, pT), (pH, pH), (pW, pW)],
            dimension_numbers=("NCDHW", "OIDHW", "NDHWC"),
        )  # (N, T', H', W', K)
        return patches.reshape(N * To * Ho * Wo, K), (N, To, Ho, Wo)

    def __call__(self, x, keep_spatial=False):
        # bf16 streamed operands: halves HBM traffic on the im2col intermediate
        # and doubles MXU rate; accumulation/bias stay f32 inside the kernel.
        patches, (N, To, Ho, Wo) = self._im2col(x.astype(jnp.bfloat16))
        w2d = self.weight.reshape(self.dim_out, -1).T.astype(jnp.bfloat16)  # (K, D)
        out = _proj_matmul(patches, w2d, self.bias, out_dtype=self.out_dtype)

        conv_shape = (N, self.dim_out, To, Ho, Wo)
        if keep_spatial:
            # TODO(synk): if keep_spatial is a hot path, emit the (N,D,T',H',W')
            # layout straight from the kernel's out_specs (D-major tiles) to
            # avoid this extra read+write pass over the output.
            x_conv = out.reshape(N, To, Ho, Wo, self.dim_out)
            x_conv = jnp.transpose(x_conv, (0, 4, 1, 2, 3))
            return x_conv, conv_shape
        # flatten(2).transpose(1, 2) -> (N, T'*H'*W', D)
        return out.reshape(N, To * Ho * Wo, self.dim_out), conv_shape


# ---------------------------------------------------------------------------
# Independent reference: XLA Conv3d with the same bf16-in / f32-accumulate math.
# (Exercises the whole im2col + projection pipeline, including column ordering.)
# ---------------------------------------------------------------------------
def _reference(module, x):
    w = module.weight.astype(jnp.bfloat16)  # (D, C, kT, kH, kW)
    conv = jax.lax.conv_general_dilated(
        x.astype(jnp.bfloat16), w,
        window_strides=module.stride,
        padding=[(p, p) for p in module.padding],
        dimension_numbers=("NCDHW", "OIDHW", "NCDHW"),
        preferred_element_type=jnp.float32,
    )
    conv = conv + module.bias[None, :, None, None, None]
    N, D, To, Ho, Wo = conv.shape
    seq = jnp.transpose(conv.reshape(N, D, To * Ho * Wo), (0, 2, 1))
    return seq, conv


if __name__ == "__main__":
    key = jax.random.PRNGKey(0)
    kx, kp = jax.random.split(key)

    # Small shapes consistent with the module defaults (kernel (1,16,16),
    # stride (1,4,4), padding (1,7,7)); dim_out shrunk to 32 to stay small.
    N, C, T, H, W = 2, 3, 4, 16, 16
    x = jax.random.normal(kx, (N, C, T, H, W), jnp.float32)

    pe = PatchEmbed(dim_in=C, dim_out=32, key=kp)

    out, conv_shape = pe(x)
    out = jax.block_until_ready(out)

    ref_seq, ref_conv = _reference(pe, x)
    assert out.shape == ref_seq.shape, (out.shape, ref_seq.shape)
    assert conv_shape == (N, 32, 6, 4, 4), conv_shape
    assert jnp.allclose(out.astype(jnp.float32), ref_seq, atol=2e-2, rtol=2e-2), (
        float(jnp.max(jnp.abs(out.astype(jnp.float32) - ref_seq))))

    # Also exercise keep_spatial=True path.
    x_conv, conv_shape2 = pe(x, keep_spatial=True)
    x_conv = jax.block_until_ready(x_conv)
    assert x_conv.shape == conv_shape2 == (N, 32, 6, 4, 4)
    assert jnp.allclose(x_conv.astype(jnp.float32), ref_conv, atol=2e-2, rtol=2e-2), (
        float(jnp.max(jnp.abs(x_conv.astype(jnp.float32) - ref_conv))))

    print("KERNEL_OK")
</pallas_src>

<mosaic_0001>
module attributes {stable_mosaic.version = 11 : i64} {
  func.func @_proj_kernel(%arg0: i32, %arg1: memref<128x768xbf16, #tpu.memory_space<vmem>>, %arg2: memref<768x128xbf16, #tpu.memory_space<vmem>>, %arg3: memref<1x128xf32, #tpu.memory_space<vmem>>, %arg4: memref<128x128xbf16, #tpu.memory_space<vmem>>) attributes {dimension_semantics = [#tpu.dimension_semantics<parallel>], iteration_bounds = array<i64: 2>, scalar_prefetch = 0 : i64, scratch_operands = 0 : i64, tpu.core_type = #tpu.core_type<tc>, window_params = [{transform_indices = @transform_0, window_bounds = array<i64: 128, 768>}, {pipeline_mode = #tpu.pipeline_mode<synchronous>, transform_indices = @transform_1, window_bounds = array<i64: 768, 128>}, {pipeline_mode = #tpu.pipeline_mode<synchronous>, transform_indices = @transform_2, window_bounds = array<i64: 1, 128>}, {transform_indices = @transform_3, window_bounds = array<i64: 128, 128>}]} {
    %c0 = arith.constant 0 : index
    %c0_0 = arith.constant 0 : index
    %0 = vector.load %arg1[%c0, %c0_0] : memref<128x768xbf16, #tpu.memory_space<vmem>>, vector<128x768xbf16>
    %c0_1 = arith.constant 0 : index
    %c0_2 = arith.constant 0 : index
    %1 = vector.load %arg2[%c0_1, %c0_2] : memref<768x128xbf16, #tpu.memory_space<vmem>>, vector<768x128xbf16>
    %cst = arith.constant dense<0.000000e+00> : vector<128x128xf32>
    %2 = tpu.matmul %0, %1, %cst {dimension_numbers = #tpu.dot_dimension_numbers<[1], [0], [0], [1], [0, 0, 1, 1], [], []>} : vector<128x768xbf16>, vector<768x128xbf16>, vector<128x128xf32> -> vector<128x128xf32>
    %c0_3 = arith.constant 0 : index
    %c0_4 = arith.constant 0 : index
    %3 = vector.load %arg3[%c0_3, %c0_4] : memref<1x128xf32, #tpu.memory_space<vmem>>, vector<1x128xf32>
    %4 = vector.broadcast %3 : vector<1x128xf32> to vector<128x128xf32>
    %5 = arith.addf %2, %4 : vector<128x128xf32>
    %6 = arith.truncf %5 : vector<128x128xf32> to vector<128x128xbf16>
    %c0_5 = arith.constant 0 : index
    %c0_6 = arith.constant 0 : index
    %7 = vector.load %arg4[%c0_5, %c0_6] : memref<128x128xbf16, #tpu.memory_space<vmem>>, vector<128x128xbf16>
    tpu.vector_store %arg4[%c0_5, %c0_6], %6 {strides = array<i32>} : memref<128x128xbf16, #tpu.memory_space<vmem>>, vector<128x128xbf16>,
    return
  }
  func.func @transform_0(%arg0: i32) -> (i32, i32) {
    %c0_i32 = arith.constant 0 : i32
    %c0_i32_0 = arith.constant 0 : i32
    return %arg0, %c0_i32 : i32, i32
  }
  func.func @transform_1(%arg0: i32) -> (i32, i32) {
    %c0_i32 = arith.constant 0 : i32
    %c0_i32_0 = arith.constant 0 : i32
    %c0_i32_1 = arith.constant 0 : i32
    return %c0_i32, %c0_i32_0 : i32, i32
  }
  func.func @transform_2(%arg0: i32) -> (i32, i32) {
    %c0_i32 = arith.constant 0 : i32
    %c0_i32_0 = arith.constant 0 : i32
    %c0_i32_1 = arith.constant 0 : i32
    return %c0_i32, %c0_i32_0 : i32, i32
  }
  func.func @transform_3(%arg0: i32) -> (i32, i32) {
    %c0_i32 = arith.constant 0 : i32
    %c0_i32_0 = arith.constant 0 : i32
    return %arg0, %c0_i32 : i32, i32
  }
}

</mosaic_0001>

<bundles_post_ra>
// kernel: tpu_custom_call.1
= control target key start
LH: loop header
LB: loop body
LE: loop exit
PB: predicated region body
PF: predicated region fallthrough
CT: control target
= control target key end

     0   :  { %8 = vsyncpa [#allocation3], 0  ;;  %s2426_s0 = inlined_call_operand.hbm [shape: bf16[256,768], index: 0, kind: input, shape index: {}]   ;;  %s2427_s1 = inlined_call_operand.hbm [shape: bf16[768,128], index: 1, kind: input, shape index: {}]   ;;  %s2428_s2 = inlined_call_operand.vmem [shape: f32[1,128], index: 2, kind: input, shape index: {}]   ;;  %s2429_s3 = inlined_call_operand.hbm [shape: bf16[256,128], index: 3, kind: output, shape index: {}]  }
   0x1   :  { %10 = vsyncpa [#allocation3 + $0x1], 0 }
   0x2   :  { %11 = vsyncpa [#allocation6], 0 }
   0x3   :  { %12 = vsyncpa [#allocation4], 0 }
   0x4   :  { %14 = vsyncpa [#allocation4 + $0x1], 0  ;;  %s2097_s12 = smov 0   ;;  %s2099_s13 = smov 0  }
   0x5   :  { %s2101_s14 = smov 0   ;;  %s2103_s15 = smov 0  }
   0x6 LB: > { %s2118_s16 = sadd.s32 4294967295, %s2068_s15   ;;  %s1312_s17 = sadd.s32 4294967294, %s2068_s15   ;;  %s2068_s15 = sphi %s2103_s15, %s2439_s15   ;;  %s2064_s14 = sphi %s2101_s14, %s2438_s14   ;;  %s2060_s13 = sphi %s2099_s13, %s2437_s13   ;;  %s2056_s12 = sphi %s2097_s12, %s2436_s12  }
   0x7   : > { %p40_p0 = scmp.ne.s32.totalorder %s2060_s13, %s2056_s12  ;;  %p41_p1 = scmp.eq.s32.totalorder %s2118_s16, 0 }
   0x8   : > { %p106_p2 = scmp.eq.s32.totalorder %s2118_s16, 1  ;;  %p112_p3 = scmp.eq.s32.totalorder %s1312_s17, 1 }
   0x9   : > { %p2127_p4 = por %p41_p1, %p40_p0  ;;  %p1313_p5 = scmp.ge.s32.totalorder %s2068_s15, 1 }
   0xa   : > { %p2132_p6 = por %p112_p3, %p40_p0  ;;  %p119_p7 = scmp.lt.s32.totalorder %s2068_s15, 3 }
   0xb   : > { %s130_s22 = sshll.u32 %s2427_s1, 4  ;;  %s2070_s24 = smov [#allocation5]   ;;  %s131_s22 = int_to_ptr.hbm [resolvable:$true] %s130_s22 }
   0xc   : > { %p2140_p8 = pnand %p1313_p5, %p119_p7  ;;  %s132_s25 = sshll.u32 %s2070_s24, 4  ;;  %s133_s25 = int_to_ptr.vmem [resolvable:$true] %s132_s25 }
   0xd   : > { %s2150_s26 = sadd.s32 1, %s2068_s15   ;;  %s2071_s27 = smov 64  }
   0xe   : > { %p1882_p9 = pneg %p2140_p8  ;;  %s2072_s28 = smov 4  }
   0xf   : > { %s24_s29 = ssub.s32 %s2068_s15, %s2150_s26  ;;  %s27_s30 = sadd.s32 1, %s2064_s14 }
  0x10   : > { %p1883_p10 = pnand %p1882_p9, %p41_p1  ;;  %p25_p12 = scmp.eq.s32.totalorder %s24_s29, 0 }
  0x11   : > { %p34_p13 = scmp.ne.s32.totalorder %s2064_s14, %s2060_s13  ;;  %p35_p0 = scmp.eq.s32.totalorder %s2068_s15, 0 }
  0x12   : > { %1885 = dma.hbm_to_vmem [thread:$0]  (!%p1883_p10), %s131_s22, 6144, %s133_s25, [#allocation6], %s2071_s27, %s2071_s27, %s2072_s28  }
  0x13   : > { %p1895_p3 = scmp.lt.s32.totalorder %s2068_s15, 2  ;;  %p36_p5 = por %p35_p0, %p34_p13 }
  0x14   : > { %s2160_s4 = scalar_select %p25_p12, %s2064_s14, %s27_s30  }
  0x15   : > { %p2164_p7 = por %p106_p2, %p34_p13  ;;  %s149_s6 = sand.u32 1, %s2064_s14  }
  0x16   : > { %s1872_s7 = smul.u32 384, %s2068_s15  ;;  %p2173_p9 = pnand %p1895_p3, %p36_p5 }
  0x17   : > { %s1871_s8 = smul.u32 384, %s149_s6  ;;  %s150_s24 = scalar_lea.sflag [#allocation3], %s149_s6 }
  0x18   : > { %s159_s11 = scalar_lea.hbm %s2426_s0, %s1872_s7  ;;  %p1972_p10 = pneg %p2173_p9 }
  0x19   : > { %s160_s20 = sshll.u32 %s159_s11, 4  ;;  %s153_s21 = scalar_lea.vmem [#allocation2], %s1871_s8  ;;  %s161_s20 = int_to_ptr.hbm [resolvable:$true] %s160_s20 }
  0x1a   : > { %s162_s22 = sshll.u32 %s153_s21, 4  ;;  %s1968_s25 = sshra.s32 %s161_s20, 4  ;;  %s163_s22 = int_to_ptr.vmem [resolvable:$true] %s162_s22  ;;  %s1969_s25 = int_to_ptr.hbm [resolvable:$true] %s1968_s25 }
  0x1b   : > { %s1970_s27 = scalar_lea.hbm %s1969_s25, 384  ;;  %s1975_s30 = scalar_lea.hbm %s2426_s0, 768 }
  0x1c   : > { %p1971_p2 = scmp.ne.s32.totalorder %s1969_s25, %s1970_s27  ;;  %p1976_p0 = scmp.lt.s32.totalorder %s1969_s25, %s2426_s0 }
  0x1d   : > { %p1977_p3 = scmp.lt.s32.totalorder %s1975_s30, %s1970_s27 }
  0x1e   : > { %p1973_p12 = pnand %p1972_p10, %p1971_p2 }
  0x1f   : > { %p1978_p5 = por %p1977_p3, %p1976_p0 }
  0x20   : > { %p1974_p13 = pneg %p1973_p12 }
  0x22   : > { %p1979_p11 = pnand %p1978_p5, %p1974_p13 }
  0x24   : > { %1982 = shalt.err (!%p1979_p11)
}
  0x25   : > { %s2073_s6 = smov 384   ;;  %s2074_s8 = smov 24  }
  0x26   : > { %1889 = dma.hbm_to_vmem [thread:$0]  (!%p2173_p9), %s161_s20, 6144, %s163_s22, %s150_s24, %s2073_s6, %s2073_s6, %s2074_s8  }
  0x27   : > { %174 = sbr.rel (%p2140_p8) target bundleno = 409 (0x199), region = 32  ;;  %s2190_s10 = sand.u32 (!%p2140_p8), 1, %s2060_s13  }
  0x28   : > { %s1873_s11 = smul.u32 (!%p2140_p8), 384, %s2190_s10  ;;  %s177_s21 = scalar_lea.sflag (!%p2140_p8), [#allocation3], %s2190_s10 }
  0x2a   : > { %s2194_s25 = scalar_lea.vmem (!%p2140_p8), [#allocation2], %s1873_s11 }
  0x2c   : > { %2043 = dma.done.wait (%p2127_p4), %s177_s21, 6144  }
  0x2d   : > { %2045 = vsyncadd (%p2127_p4), %s177_s21, 4294961152 }
  0x2e   : > { %2047 = dma.done.wait (%p41_p1), [#allocation6], 6144  }
  0x2f   : > { %2049 = vsyncadd (%p41_p1), [#allocation6], 4294961152  ;;  %v1766_v0 = vld [vmem:[#allocation5 + $0x38] sm:$0xff]  ;;  %v1765_v2 = vld [vmem:[#allocation5 + $0x30] sm:$0xff]  ;;  %s1321_s17 = sshll.u32 %s2190_s10, 6  ;;  %s1807_s22 = sshll.u32 %s2118_s16, 6 }
  0x30   : > { %v1774_v1 = vld [vmem:[#allocation5 + $0x78] sm:$0xff]  ;;  %1855 = vmatpush.bf16.msra.mxu2 %v1766_v0  ;;  %v1773_v3 = vld [vmem:[#allocation5 + $0x70] sm:$0xff]  ;;  %887 = vmatpush.bf16.msra.mxu0 %v1766_v0  ;;  %v1764_v4 = vld [vmem:[#allocation5 + $0x28] sm:$0xff]  ;;  %s2364_s20 = scalar_lea.vmem [#allocation7], %s1321_s17  ;;  %s1225_s28 = scalar_lea.hbm %s2429_s3, %s1807_s22 }
  0x31   : > { %1863 = vmatpush.bf16.msra.mxu3 %v1774_v1  ;;  %936 = vmatpush.bf16.msra.mxu1 %v1774_v1  ;;  %v1772_v5 = vld [vmem:[#allocation5 + $0x68] sm:$0xff]  ;;  %v1763_v6 = vld [vmem:[#allocation5 + $0x20] sm:$0xff]  ;;  %v1762_v8 = vld [vmem:[#allocation5 + $0x18] sm:$0xff]  ;;  %s1226_s29 = sshll.u32 %s2364_s20, 4  ;;  %s1228_s30 = sshll.u32 %s1225_s28, 4  ;;  %s1227_s29 = int_to_ptr.vmem [resolvable:$true] %s1226_s29  ;;  %s1229_s30 = int_to_ptr.hbm [resolvable:$true] %s1228_s30 }
  0x32   : > { %v1771_v7 = vld [vmem:[#allocation5 + $0x60] sm:$0xff]  ;;  %v1770_v9 = vld [vmem:[#allocation5 + $0x58] sm:$0xff]  ;;  %v1761_v10 = vld [vmem:[#allocation5 + $0x10] sm:$0xff]  ;;  %s1214_s16 = scalar_lea.sflag [#allocation4], %s2190_s10  ;;  %s2012_s7 = sshra.s32 %s1229_s30, 4  ;;  %s2013_s7 = int_to_ptr.hbm [resolvable:$true] %s2012_s7 }
  0x33   : > { %v1769_v11 = vld [vmem:[#allocation5 + $0x50] sm:$0xff]  ;;  %v1760_v12 = vld [vmem:[#allocation5 + $0x8] sm:$0xff]  ;;  %v1759_v14 = vld [vmem:[#allocation5] sm:$0xff]  ;;  %s2014_s9 = scalar_lea.hbm %s2013_s7, 64  ;;  %s2018_s11 = scalar_lea.hbm %s2429_s3, 128 }
  0x34   : > { %1856 = vmatpush.bf16.msra.mxu2 %v1765_v2  ;;  %888 = vmatpush.bf16.msra.mxu0 %v1765_v2  ;;  %v1768_v13 = vld [vmem:[#allocation5 + $0x48] sm:$0xff]  ;;  %v1767_v15 = vld [vmem:[#allocation5 + $0x40] sm:$0xff]  ;;  %v1738_v17 = vld [vmem:[%s2194_s25 + $0xd4] sm:$0xf0]  ;;  %p2015_p1 = scmp.ne.s32.totalorder %s2013_s7, %s2014_s9  ;;  %p2019_p11 = scmp.lt.s32.totalorder %s2013_s7, %s2429_s3 }
  0x35   : > { %1864 = vmatpush.bf16.msra.mxu3 %v1773_v3  ;;  %937 = vmatpush.bf16.msra.mxu1 %v1773_v3  ;;  %v1420_v16 = vld [vmem:[%s2194_s25 + $0xc0] sm:$0xf]  ;;  %v1735_v18 = vld [vmem:[%s2194_s25 + $0xc4] sm:$0xf]  ;;  %v1422_v19 = vld [vmem:[%s2194_s25 + $0xd8] sm:$0xf0]  ;;  %p2020_p9 = scmp.lt.s32.totalorder %s2018_s11, %s2014_s9 }
  0x36   : > { %v1782_v20 = vld [vmem:[#allocation5 + $0xb8] sm:$0xff]  ;;  %v1324_v21 = vld [vmem:[%s2194_s25] sm:$0xf]  ;;  %v1711_v24 = vld [vmem:[%s2194_s25 + $0x4] sm:$0xf]  ;;  %v1421_v26 = vor.u32 %v1738_v17, %v1420_v16  ;;  %v1425_v27 = vor.u32 %v1735_v18, %v1422_v19  ;;  %p2016_p4 = pnand %p2015_p1, %p2164_p7 }
  0x37   : > { %v1714_v22 = vld [vmem:[%s2194_s25 + $0x14] sm:$0xf0]  ;;  %v1326_v25 = vld [vmem:[%s2194_s25 + $0x18] sm:$0xf0]  ;;  %v1781_v31 = vld [vmem:[#allocation5 + $0xb0] sm:$0xff]  ;;  %p2021_p2 = por %p2020_p9, %p2019_p11 }
  0x38   : > { %1857 = vmatpush.bf16.msra.mxu2 %v1764_v4  ;;  %889 = vmatpush.bf16.msra.mxu0 %v1764_v4  ;;  %v1790_v23 = vld [vmem:[#allocation5 + $0xf8] sm:$0xff]  ;;  %v1325_v28 = vor.u32 %v1714_v22, %v1324_v21  ;;  %v1329_v30 = vor.u32 %v1711_v24, %v1326_v25  ;;  %v1789_v32 = vld [vmem:[#allocation5 + $0xf0] sm:$0xff]  ;;  %v1780_v35 = vld [vmem:[#allocation5 + $0xa8] sm:$0xff]  ;;  %p2017_p8 = pneg %p2016_p4 }
  0x39   : > { %1865 = vmatpush.bf16.msra.mxu3 %v1772_v5  ;;  %938 = vmatpush.bf16.msra.mxu1 %v1772_v5  ;;  %v1806_v29 = vld [vmem:[#allocation5 + $0x178] sm:$0xff]  ;;  %v1805_v34 = vld [vmem:[#allocation5 + $0x170] sm:$0xff]  ;;  %v1788_v36 = vld [vmem:[#allocation5 + $0xe8] sm:$0xff] }
  0x3a   : > { %v1798_v33 = vld [vmem:[#allocation5 + $0x138] sm:$0xff]  ;;  %v1797_v37 = vld [vmem:[#allocation5 + $0x130] sm:$0xff]  ;;  %v1804_v38 = vld [vmem:[#allocation5 + $0x168] sm:$0xff]  ;;  %p2022_p10 = pnand %p2021_p2, %p2017_p8 }
  0x3b   : > { %v1779_v39 = vld [vmem:[#allocation5 + $0xa0] sm:$0xff]  ;;  %v1796_v41 = vld [vmem:[#allocation5 + $0x128] sm:$0xff]  ;;  %v1444_v42 = vld [vmem:[%s2194_s25 + $0xf0] sm:$0xf] }
  0x3c   : > { %1858 = vmatpush.bf16.msra.mxu2 %v1763_v6  ;;  %890 = vmatpush.bf16.msra.mxu0 %v1763_v6  ;;  %v1787_v40 = vld [vmem:[#allocation5 + $0xe0] sm:$0xff]  ;;  %v1744_v43 = vld [vmem:[%s2194_s25 + $0x104] sm:$0xf0]  ;;  %v1741_v44 = vld [vmem:[%s2194_s25 + $0xf4] sm:$0xf] }
  0x3d   : > { %1866 = vmatpush.bf16.msra.mxu3 %v1771_v7  ;;  %939 = vmatpush.bf16.msra.mxu1 %v1771_v7  ;;  %v1446_v45 = vld [vmem:[%s2194_s25 + $0x108] sm:$0xf0]  ;;  %v1348_v46 = vld [vmem:[%s2194_s25 + $0x30] sm:$0xf]  ;;  %v1803_v47 = vld [vmem:[#allocation5 + $0x160] sm:$0xff]  ;;  %v1445_v54 = vor.u32 %v1744_v43, %v1444_v42 }
  0x3e   : > { %v1720_v48 = vld [vmem:[%s2194_s25 + $0x44] sm:$0xf0]  ;;  %v1717_v49 = vld [vmem:[%s2194_s25 + $0x34] sm:$0xf]  ;;  %v1778_v50 = vld [vmem:[#allocation5 + $0x98] sm:$0xff]  ;;  %v1449_v55 = vor.u32 %v1741_v44, %v1446_v45 }
  0x3f   : > { %v1350_v51 = vld [vmem:[%s2194_s25 + $0x48] sm:$0xf0]  ;;  %v1786_v52 = vld [vmem:[#allocation5 + $0xd8] sm:$0xff]  ;;  %v1795_v53 = vld [vmem:[#allocation5 + $0x120] sm:$0xff]  ;;  %v1349_v56 = vor.u32 %v1720_v48, %v1348_v46 }
  0x40   : > { %1859 = vmatpush.bf16.msra.mxu2 %v1762_v8  ;;  %891 = vmatpush.bf16.msra.mxu0 %v1762_v8  ;;  %v1802_v57 = vld [vmem:[#allocation5 + $0x158] sm:$0xff]  ;;  %v1353_v58 = vor.u32 %v1717_v49, %v1350_v51  ;;  %v1777_v59 = vld [vmem:[#allocation5 + $0x90] sm:$0xff]  ;;  %v1776_v62 = vld [vmem:[#allocation5 + $0x88] sm:$0xff] }
  0x41   : > { %1867 = vmatpush.bf16.msra.mxu3 %v1770_v9  ;;  %940 = vmatpush.bf16.msra.mxu1 %v1770_v9  ;;  %v1785_v60 = vld [vmem:[#allocation5 + $0xd0] sm:$0xff]  ;;  %v1794_v61 = vld [vmem:[#allocation5 + $0x118] sm:$0xff]  ;;  %v1784_v0 = vld [vmem:[#allocation5 + $0xc8] sm:$0xff] }
  0x42   : > { %v1801_v63 = vld [vmem:[#allocation5 + $0x150] sm:$0xff]  ;;  %v1800_v2 = vld [vmem:[#allocation5 + $0x148] sm:$0xff]  ;;  %v1775_v3 = vld [vmem:[#allocation5 + $0x80] sm:$0xff] }
  0x43   : > { %v1793_v1 = vld [vmem:[#allocation5 + $0x110] sm:$0xff]  ;;  %v1783_v4 = vld [vmem:[#allocation5 + $0xc0] sm:$0xff]  ;;  %v1792_v5 = vld [vmem:[#allocation5 + $0x108] sm:$0xff] }
  0x44   : > { %1860 = vmatpush.bf16.msra.mxu2 %v1761_v10  ;;  %892 = vmatpush.bf16.msra.mxu0 %v1761_v10  ;;  %v1468_v6 = vld [vmem:[%s2194_s25 + $0x120] sm:$0xf]  ;;  %v1750_v7 = vld [vmem:[%s2194_s25 + $0x134] sm:$0xf0]  ;;  %v1747_v8 = vld [vmem:[%s2194_s25 + $0x124] sm:$0xf] }
  0x45   : > { %1868 = vmatpush.bf16.msra.mxu3 %v1769_v11  ;;  %941 = vmatpush.bf16.msra.mxu1 %v1769_v11  ;;  %v1470_v9 = vld [vmem:[%s2194_s25 + $0x138] sm:$0xf0]  ;;  %v1372_v10 = vld [vmem:[%s2194_s25 + $0x60] sm:$0xf]  ;;  %v1726_v11 = vld [vmem:[%s2194_s25 + $0x74] sm:$0xf0] }
  0x46   : > { %v1473_v16 = vor.u32 %v1747_v8, %v1470_v9  ;;  %v1373_v17 = vor.u32 %v1726_v11, %v1372_v10  ;;  %v1799_v19 = vld [vmem:[#allocation5 + $0x140] sm:$0xff]  ;;  %v1756_v21 = vld [vmem:[%s2194_s25 + $0x164] sm:$0xf0]  ;;  %v1753_v22 = vld [vmem:[%s2194_s25 + $0x154] sm:$0xf] }
  0x47   : > { %v1396_v24 = vld [vmem:[%s2194_s25 + $0x90] sm:$0xf]  ;;  %v1732_v25 = vld [vmem:[%s2194_s25 + $0xa4] sm:$0xf0]  ;;  %v1356_v44 = vld [vmem:[%s2194_s25 + $0x38] sm:$0xf] }
  0x48   : > { %1861 = vmatpush.bf16.msra.mxu2 %v1760_v12  ;;  %893 = vmatpush.bf16.msra.mxu0 %v1760_v12  ;;  %v1723_v12 = vld [vmem:[%s2194_s25 + $0x64] sm:$0xf]  ;;  %v1721_v45 = vld [vmem:[%s2194_s25 + $0x4c] sm:$0xf0]  ;;  %v1718_v46 = vld [vmem:[%s2194_s25 + $0x3c] sm:$0xf] }
  0x49   : > { %1869 = vmatpush.bf16.msra.mxu3 %v1768_v13  ;;  %942 = vmatpush.bf16.msra.mxu1 %v1768_v13  ;;  %v1374_v13 = vld [vmem:[%s2194_s25 + $0x78] sm:$0xf0]  ;;  %v1364_v48 = vld [vmem:[%s2194_s25 + $0x40] sm:$0xf]  ;;  %v1722_v49 = vld [vmem:[%s2194_s25 + $0x54] sm:$0xf0] }
  0x4a   : > { %v1377_v18 = vor.u32 %v1723_v12, %v1374_v13  ;;  %v1366_v51 = vld [vmem:[%s2194_s25 + $0x58] sm:$0xf0]  ;;  %v1412_v8 = vld [vmem:[%s2194_s25 + $0xa0] sm:$0xf]  ;;  %v1734_v9 = vld [vmem:[%s2194_s25 + $0xb4] sm:$0xf0] }
  0x4b   : > { %v1731_v10 = vld [vmem:[%s2194_s25 + $0xa4] sm:$0xf]  ;;  %v1414_v11 = vld [vmem:[%s2194_s25 + $0xb8] sm:$0xf0] }
  0x4c   : > { %1862 = vmatpush.bf16.msra.mxu2 %v1759_v14  ;;  %894 = vmatpush.bf16.msra.mxu0 %v1759_v14  ;;  %v1791_v14 = vld [vmem:[#allocation5 + $0x100] sm:$0xff] }
  0x4d   : > { %1870 = vmatpush.bf16.msra.mxu3 %v1767_v15  ;;  %943 = vmatpush.bf16.msra.mxu1 %v1767_v15  ;;  %v1469_v15 = vor.u32 %v1750_v7, %v1468_v6  ;;  %v1730_v6 = vld [vmem:[%s2194_s25 + $0x9c] sm:$0xf]  ;;  %v1406_v7 = vld [vmem:[%s2194_s25 + $0xb0] sm:$0xf0] }
  0x4e   : > { %v1409_v13 = vor.u32 %v1730_v6, %v1406_v7  ;;  %v1752_v6 = vld [vmem:[%s2194_s25 + $0x144] sm:$0xf0] }
  0x4f   : > { %915 = vmatmul.bf16.vlgmr.msra.gmra.mxu2 %v1421_v26  ;;  %895 = vmatmul.bf16.vlgmr.msra.gmra.mxu0 %v1325_v28  ;;  %v1729_v26 = vld [vmem:[%s2194_s25 + $0x94] sm:$0xf] }
  0x50   : > { %985 = vmatpush.bf16.msrb.mxu2 %v1782_v20  ;;  %964 = vmatmul.bf16.vlgmr.msra.gmra.mxu3 %v1425_v27  ;;  %v1492_v20 = vld [vmem:[%s2194_s25 + $0x150] sm:$0xf]  ;;  %v1398_v27 = vld [vmem:[%s2194_s25 + $0xa8] sm:$0xf0] }
  0x51   : > { %1034 = vmatpush.bf16.msrb.mxu3 %v1790_v23  ;;  %1132 = vmatpush.bf16.msrb.mxu1 %v1806_v29  ;;  %v1494_v23 = vld [vmem:[%s2194_s25 + $0x168] sm:$0xf0]  ;;  %v1493_v28 = vor.u32 %v1756_v21, %v1492_v20  ;;  %v1436_v20 = vld [vmem:[%s2194_s25 + $0xd0] sm:$0xf]  ;;  %v1740_v21 = vld [vmem:[%s2194_s25 + $0xe4] sm:$0xf0] }
  0x52   : > { %944 = vmatmul.bf16.vlgmr.msra.gmra.mxu1 %v1329_v30  ;;  %1083 = vmatpush.bf16.msrb.mxu0 %v1798_v33  ;;  %v1497_v29 = vor.u32 %v1753_v22, %v1494_v23  ;;  %v1397_v30 = vor.u32 %v1732_v25, %v1396_v24  ;;  %v1715_v33 = vld [vmem:[%s2194_s25 + $0x1c] sm:$0xf0]  ;;  %v1737_v22 = vld [vmem:[%s2194_s25 + $0xd4] sm:$0xf]  ;;  %v1438_v23 = vld [vmem:[%s2194_s25 + $0xe8] sm:$0xf0] }
  0x54   : > { %986 = vmatpush.bf16.msrb.mxu2 %v1781_v31  ;;  %v1401_v31 = vor.u32 %v1729_v26, %v1398_v27  ;;  %v2279_v26 = vld [vmem:[%s2428_s2] ss:$0 sm:$0xff]  ;;  %v1437_v27 = vor.u32 %v1740_v21, %v1436_v20 }
  0x55   : > { %1035 = vmatpush.bf16.msrb.mxu3 %v1789_v32  ;;  %1133 = vmatpush.bf16.msrb.mxu1 %v1805_v34  ;;  %v1332_v32 = vld [vmem:[%s2194_s25 + $0x8] sm:$0xf]  ;;  %v1712_v34 = vld [vmem:[%s2194_s25 + $0xc] sm:$0xf] }
  0x56   : > { %1084 = vmatpush.bf16.msrb.mxu0 %v1797_v37  ;;  %v1716_v37 = vld [vmem:[%s2194_s25 + $0x24] sm:$0xf0] }
  0x58   : > { %987 = vmatpush.bf16.msrb.mxu2 %v1780_v35  ;;  %v1334_v35 = vld [vmem:[%s2194_s25 + $0x20] sm:$0xf0] }
  0x59   : > { %1036 = vmatpush.bf16.msrb.mxu3 %v1788_v36  ;;  %1134 = vmatpush.bf16.msrb.mxu1 %v1804_v38  ;;  %v1340_v36 = vld [vmem:[%s2194_s25 + $0x10] sm:$0xf]  ;;  %v1713_v38 = vld [vmem:[%s2194_s25 + $0x14] sm:$0xf] }
  0x5a   : > { %1085 = vmatpush.bf16.msrb.mxu0 %v1796_v41  ;;  %v1337_v41 = vor.u32 %v1712_v34, %v1334_v35  ;;  %v1341_v42 = vor.u32 %v1716_v37, %v1340_v36 }
  0x5c   : > { %988 = vmatpush.bf16.msrb.mxu2 %v1779_v39  ;;  %v1342_v39 = vld [vmem:[%s2194_s25 + $0x28] sm:$0xf0] }
  0x5d   : > { %1037 = vmatpush.bf16.msrb.mxu3 %v1787_v40  ;;  %1135 = vmatpush.bf16.msrb.mxu1 %v1803_v47  ;;  %v1333_v40 = vor.u32 %v1715_v33, %v1332_v32  ;;  %v1345_v43 = vor.u32 %v1713_v38, %v1342_v39  ;;  %v1358_v47 = vld [vmem:[%s2194_s25 + $0x50] sm:$0xf0]  ;;  %v1452_v39 = vld [vmem:[%s2194_s25 + $0xf8] sm:$0xf] }
  0x5e   : > { %1086 = vmatpush.bf16.msrb.mxu0 %v1795_v53  ;;  %v1361_v53 = vor.u32 %v1718_v46, %v1358_v47  ;;  %v1743_v47 = vld [vmem:[%s2194_s25 + $0x104] sm:$0xf] }
  0x5f   : > { %920 = vmatmul.bf16.gmra.mxu2 %v1445_v54  ;;  %900 = vmatmul.bf16.gmra.mxu0 %v1349_v56  ;;  %v1365_v54 = vor.u32 %v1722_v49, %v1364_v48  ;;  %v1380_v56 = vld [vmem:[%s2194_s25 + $0x68] sm:$0xf]  ;;  %v1462_v48 = vld [vmem:[%s2194_s25 + $0x118] sm:$0xf0] }
  0x60   : > { %989 = vmatpush.bf16.msrb.mxu2 %v1778_v50  ;;  %969 = vmatmul.bf16.gmra.mxu3 %v1449_v55  ;;  %v1719_v50 = vld [vmem:[%s2194_s25 + $0x44] sm:$0xf] }
  0x61   : > { %1038 = vmatpush.bf16.msrb.mxu3 %v1786_v52  ;;  %1136 = vmatpush.bf16.msrb.mxu1 %v1802_v57  ;;  %v1357_v52 = vor.u32 %v1721_v45, %v1356_v44  ;;  %v1369_v55 = vor.u32 %v1719_v50, %v1366_v51  ;;  %v1727_v57 = vld [vmem:[%s2194_s25 + $0x7c] sm:$0xf0]  ;;  %v1746_v44 = vld [vmem:[%s2194_s25 + $0x114] sm:$0xf0] }
  0x62   : > { %949 = vmatmul.bf16.gmra.mxu1 %v1353_v58  ;;  %1087 = vmatpush.bf16.msrb.mxu0 %v1794_v61  ;;  %v1724_v58 = vld [vmem:[%s2194_s25 + $0x6c] sm:$0xf]  ;;  %v1728_v61 = vld [vmem:[%s2194_s25 + $0x84] sm:$0xf0] }
  0x64   : > { %990 = vmatpush.bf16.msrb.mxu2 %v1777_v59  ;;  %v1382_v59 = vld [vmem:[%s2194_s25 + $0x80] sm:$0xf0] }
  0x65   : > { %1039 = vmatpush.bf16.msrb.mxu3 %v1785_v60  ;;  %1137 = vmatpush.bf16.msrb.mxu1 %v1801_v63  ;;  %v1388_v60 = vld [vmem:[%s2194_s25 + $0x70] sm:$0xf]  ;;  %v1390_v63 = vld [vmem:[%s2194_s25 + $0x88] sm:$0xf0] }
  0x66   : > { %1088 = vmatpush.bf16.msrb.mxu0 %v1793_v1  ;;  %v1385_v1 = vor.u32 %v1724_v58, %v1382_v59 }
  0x68   : > { %991 = vmatpush.bf16.msrb.mxu2 %v1776_v62  ;;  %v1725_v62 = vld [vmem:[%s2194_s25 + $0x74] sm:$0xf] }
  0x69   : > { %1040 = vmatpush.bf16.msrb.mxu3 %v1784_v0  ;;  %1138 = vmatpush.bf16.msrb.mxu1 %v1800_v2  ;;  %v1381_v0 = vor.u32 %v1727_v57, %v1380_v56  ;;  %v1389_v2 = vor.u32 %v1728_v61, %v1388_v60 }
  0x6a   : > { %1089 = vmatpush.bf16.msrb.mxu0 %v1792_v5  ;;  %v1733_v5 = vld [vmem:[%s2194_s25 + $0xac] sm:$0xf0] }
  0x6c   : > { %992 = vmatpush.bf16.msrb.mxu2 %v1775_v3  ;;  %v1393_v3 = vor.u32 %v1725_v62, %v1390_v63 }
  0x6d   : > { %1041 = vmatpush.bf16.msrb.mxu3 %v1783_v4  ;;  %1139 = vmatpush.bf16.msrb.mxu1 %v1799_v19  ;;  %v1404_v4 = vld [vmem:[%s2194_s25 + $0x98] sm:$0xf]  ;;  %v1430_v19 = vld [vmem:[%s2194_s25 + $0xe0] sm:$0xf0] }
  0x6e   : > { %1090 = vmatpush.bf16.msrb.mxu0 %v1791_v14  ;;  %v1405_v12 = vor.u32 %v1733_v5, %v1404_v4  ;;  %v1413_v14 = vor.u32 %v1734_v9, %v1412_v8  ;;  %v1478_v4 = vld [vmem:[%s2194_s25 + $0x140] sm:$0xf0]  ;;  %v1484_v5 = vld [vmem:[%s2194_s25 + $0x130] sm:$0xf]  ;;  %v1749_v9 = vld [vmem:[%s2194_s25 + $0x134] sm:$0xf] }
  0x6f   : > { %925 = vmatmul.bf16.gmra.mxu2 %v1469_v15  ;;  %905 = vmatmul.bf16.gmra.mxu0 %v1373_v17  ;;  %v1417_v15 = vor.u32 %v1731_v10, %v1414_v11  ;;  %v1739_v17 = vld [vmem:[%s2194_s25 + $0xdc] sm:$0xf0]  ;;  %v1486_v10 = vld [vmem:[%s2194_s25 + $0x148] sm:$0xf0] }
  0x70   : > { %974 = vmatmul.bf16.gmra.mxu3 %v1473_v16  ;;  %v1428_v16 = vld [vmem:[%s2194_s25 + $0xc8] sm:$0xf] }
  0x71   : > { %v1429_v24 = vor.u32 %v1739_v17, %v1428_v16  ;;  %v1489_v17 = vor.u32 %v1749_v9, %v1486_v10 }
  0x72   : > { %954 = vmatmul.bf16.gmra.mxu1 %v1377_v18  ;;  %v1736_v18 = vld [vmem:[%s2194_s25 + $0xcc] sm:$0xf] }
  0x73   : > { %v1433_v25 = vor.u32 %v1736_v18, %v1430_v19 }
  0x7f   : > { %930 = vmatmul.bf16.gmra.mxu2 %v1493_v28  ;;  %910 = vmatmul.bf16.gmra.mxu0 %v1397_v30 }
  0x80   : > { %979 = vmatmul.bf16.gmra.mxu3 %v1497_v29  ;;  %v1441_v29 = vor.u32 %v1737_v22, %v1438_v23 }
  0x82   : > { %959 = vmatmul.bf16.gmra.mxu1 %v1401_v31 }
  0x8f   : > { %993 = vmatmul.bf16.vlgmr.msrb.gmra.mxu2 %v1333_v40  ;;  %1091 = vmatmul.bf16.vlgmr.msrb.gmra.mxu0 %v1341_v42  ;;  %v1745_v40 = vld [vmem:[%s2194_s25 + $0x10c] sm:$0xf0]  ;;  %v1454_v42 = vld [vmem:[%s2194_s25 + $0x110] sm:$0xf0] }
  0x90   : > { %1042 = vmatmul.bf16.vlgmr.msrb.gmra.mxu3 %v1337_v41  ;;  %v1742_v41 = vld [vmem:[%s2194_s25 + $0xfc] sm:$0xf]  ;;  %v1453_v50 = vor.u32 %v1745_v40, %v1452_v39  ;;  %v1755_v40 = vld [vmem:[%s2194_s25 + $0x164] sm:$0xf] }
  0x91   : > { %v1457_v51 = vor.u32 %v1742_v41, %v1454_v42  ;;  %v1510_v41 = vld [vmem:[%s2194_s25 + $0x178] sm:$0xf0] }
  0x92   : > { %1140 = vmatmul.bf16.vlgmr.msrb.gmra.mxu1 %v1345_v43  ;;  %v1460_v43 = vld [vmem:[%s2194_s25 + $0x100] sm:$0xf] }
  0x9f   : > { %998 = vmatmul.bf16.gmra.mxu2 %v1357_v52  ;;  %1096 = vmatmul.bf16.gmra.mxu0 %v1365_v54  ;;  %v1461_v52 = vor.u32 %v1746_v44, %v1460_v43 }
  0xa0   : > { %1047 = vmatmul.bf16.gmra.mxu3 %v1361_v53 }
  0xa2   : > { %1145 = vmatmul.bf16.gmra.mxu1 %v1369_v55  ;;  %v1465_v55 = vor.u32 %v1743_v47, %v1462_v48  ;;  %v1513_v48 = vor.u32 %v1755_v40, %v1510_v41 }
  0xaf   : > { %1003 = vmatmul.bf16.gmra.mxu2 %v1381_v0  ;;  %1101 = vmatmul.bf16.gmra.mxu0 %v1389_v2  ;;  %v1751_v2 = vld [vmem:[%s2194_s25 + $0x13c] sm:$0xf0] }
  0xb0   : > { %1052 = vmatmul.bf16.gmra.mxu3 %v1385_v1  ;;  %v1476_v1 = vld [vmem:[%s2194_s25 + $0x128] sm:$0xf] }
  0xb2   : > { %1150 = vmatmul.bf16.gmra.mxu1 %v1393_v3  ;;  %v1748_v3 = vld [vmem:[%s2194_s25 + $0x12c] sm:$0xf] }
  0xbf   : > { %1008 = vmatmul.bf16.gmra.mxu2 %v1405_v12  ;;  %1106 = vmatmul.bf16.gmra.mxu0 %v1413_v14  ;;  %v1477_v12 = vor.u32 %v1751_v2, %v1476_v1  ;;  %v1485_v14 = vor.u32 %v1752_v6, %v1484_v5 }
  0xc0   : > { %1057 = vmatmul.bf16.gmra.mxu3 %v1409_v13  ;;  %v1481_v13 = vor.u32 %v1748_v3, %v1478_v4 }
  0xc2   : > { %1155 = vmatmul.bf16.gmra.mxu1 %v1417_v15 }
  0xcc   : > { %v896_v28 = vpop.f32.mrf.mxu0 }
  0xcd   : > { %v897_v30 = vadd.f32 %v2279_v26, %v896_v28  ;;  %v1500_v28 = vld [vmem:[%s2194_s25 + $0x158] sm:$0xf] }
  0xcf   : > { %v945_v31 = vpop.f32.mrf.mxu1  ;;  %1013 = vmatmul.bf16.gmra.mxu2 %v1429_v24  ;;  %1111 = vmatmul.bf16.gmra.mxu0 %v1437_v27 }
  0xd0   : > { %1062 = vmatmul.bf16.gmra.mxu3 %v1433_v25  ;;  %v2282_v32 = vadd.f32 %v945_v31, %v897_v30  ;;  %v1754_v30 = vld [vmem:[%s2194_s25 + $0x15c] sm:$0xf]  ;;  %v1502_v31 = vld [vmem:[%s2194_s25 + $0x170] sm:$0xf0] }
  0xd1   : > { %v1505_v44 = vor.u32 %v1754_v30, %v1502_v31 }
  0xd2   : > { %1160 = vmatmul.bf16.gmra.mxu1 %v1441_v29  ;;  %v916_v33 = vpop.f32.mrf.mxu2  ;;  %v1757_v29 = vld [vmem:[%s2194_s25 + $0x16c] sm:$0xf0] }
  0xd3   : > { %v965_v34 = vpop.f32.mrf.mxu3  ;;  %v917_v35 = vadd.f32 %v2279_v26, %v916_v33  ;;  %v1508_v33 = vld [vmem:[%s2194_s25 + $0x160] sm:$0xf]  ;;  %v1501_v43 = vor.u32 %v1757_v29, %v1500_v28 }
  0xd4   : > { %v2287_v37 = vpop.f32.mrf.mxu0 }
  0xd5   : > { %v2285_v36 = vadd.f32 %v965_v34, %v917_v35  ;;  %v1758_v34 = vld [vmem:[%s2194_s25 + $0x174] sm:$0xf0] }
  0xd7   : > { %v2289_v38 = vpop.f32.mrf.mxu1 }
  0xda   : > { %v918_v45 = vpop.f32.mrf.mxu2 }
  0xdb   : > { %v967_v46 = vpop.f32.mrf.mxu3  ;;  %v919_v49 = vadd.f32 %v2279_v26, %v918_v45  ;;  %v1509_v45 = vor.u32 %v1758_v34, %v1508_v33 }
  0xdc   : > { %v901_v54 = vpop.f32.mrf.mxu0 }
  0xdd   : > { %v2300_v53 = vadd.f32 %v967_v46, %v919_v49  ;;  %v902_v56 = vadd.f32 %v2279_v26, %v901_v54 }
  0xdf   : > { %v950_v57 = vpop.f32.mrf.mxu1  ;;  %1018 = vmatmul.bf16.gmra.mxu2 %v1453_v50  ;;  %1116 = vmatmul.bf16.gmra.mxu0 %v1461_v52 }
  0xe0   : > { %1067 = vmatmul.bf16.gmra.mxu3 %v1457_v51  ;;  %v2303_v58 = vadd.f32 %v950_v57, %v902_v56 }
  0xe2   : > { %1165 = vmatmul.bf16.gmra.mxu1 %v1465_v55  ;;  %v921_v59 = vpop.f32.mrf.mxu2 }
  0xe3   : > { %v970_v60 = vpop.f32.mrf.mxu3  ;;  %v922_v61 = vadd.f32 %v2279_v26, %v921_v59 }
  0xe4   : > { %v2308_v63 = vpop.f32.mrf.mxu0 }
  0xe5   : > { %v2306_v62 = vadd.f32 %v970_v60, %v922_v61 }
  0xe7   : > { %v2310_v0 = vpop.f32.mrf.mxu1 }
  0xea   : > { %v923_v7 = vpop.f32.mrf.mxu2 }
  0xeb   : > { %v972_v8 = vpop.f32.mrf.mxu3  ;;  %v924_v11 = vadd.f32 %v2279_v26, %v923_v7  ;;  %v899_v7 = vadd.f32 %v2279_v26, %v2287_v37 }
  0xec   : > { %v906_v16 = vpop.f32.mrf.mxu0 }
  0xed   : > { %v2321_v15 = vadd.f32 %v972_v8, %v924_v11  ;;  %v907_v18 = vadd.f32 %v2279_v26, %v906_v16  ;;  %v948_v11 = vadd.f32 %v2289_v38, %v899_v7 }
  0xef   : > { %v955_v19 = vpop.f32.mrf.mxu1  ;;  %1023 = vmatmul.bf16.gmra.mxu2 %v1477_v12  ;;  %1121 = vmatmul.bf16.gmra.mxu0 %v1485_v14 }
  0xf0   : > { %1072 = vmatmul.bf16.gmra.mxu3 %v1481_v13  ;;  %v2324_v20 = vadd.f32 %v955_v19, %v907_v18 }
  0xf2   : > { %1170 = vmatmul.bf16.gmra.mxu1 %v1489_v17  ;;  %v926_v21 = vpop.f32.mrf.mxu2 }
  0xf3   : > { %v975_v22 = vpop.f32.mrf.mxu3  ;;  %v927_v23 = vadd.f32 %v2279_v26, %v926_v21 }
  0xf4   : > { %v2329_v25 = vpop.f32.mrf.mxu0 }
  0xf5   : > { %v2327_v24 = vadd.f32 %v975_v22, %v927_v23 }
  0xf7   : > { %v2331_v27 = vpop.f32.mrf.mxu1 }
  0xfa   : > { %v928_v35 = vpop.f32.mrf.mxu2 }
  0xfb   : > { %v977_v39 = vpop.f32.mrf.mxu3  ;;  %v929_v42 = vadd.f32 %v2279_v26, %v928_v35 }
  0xfc   : > { %v911_v47 = vpop.f32.mrf.mxu0 }
  0xfd   : > { %v2342_v46 = vadd.f32 %v977_v39, %v929_v42  ;;  %v912_v49 = vadd.f32 %v2279_v26, %v911_v47 }
  0xff   : > { %v960_v50 = vpop.f32.mrf.mxu1  ;;  %1028 = vmatmul.bf16.gmra.mxu2 %v1501_v43  ;;  %1126 = vmatmul.bf16.gmra.mxu0 %v1509_v45 }
 0x100   : > { %1077 = vmatmul.bf16.gmra.mxu3 %v1505_v44  ;;  %v2345_v51 = vadd.f32 %v960_v50, %v912_v49 }
 0x102   : > { %1175 = vmatmul.bf16.gmra.mxu1 %v1513_v48  ;;  %v931_v52 = vpop.f32.mrf.mxu2 }
 0x103   : > { %v980_v54 = vpop.f32.mrf.mxu3  ;;  %v932_v55 = vadd.f32 %v2279_v26, %v931_v52 }
 0x104   : > { %v2350_v57 = vpop.f32.mrf.mxu0 }
 0x105   : > { %v2348_v56 = vadd.f32 %v980_v54, %v932_v55 }
 0x107   : > { %v2352_v59 = vpop.f32.mrf.mxu1 }
 0x10a   : > { %v933_v60 = vpop.f32.mrf.mxu2 }
 0x10b   : > { %v982_v61 = vpop.f32.mrf.mxu3  ;;  %v934_v1 = vadd.f32 %v2279_v26, %v933_v60 }
 0x10c   : > { %v1092_v3 = vpop.f32.mrf.mxu0 }
 0x10d   : > { %v2355_v2 = vadd.f32 %v982_v61, %v934_v1 }
 0x10f   : > { %v1141_v4 = vpop.f32.mrf.mxu1 }
 0x112   : > { %v994_v5 = vpop.f32.mrf.mxu2 }
 0x113   : > { %v1043_v6 = vpop.f32.mrf.mxu3  ;;  %v995_v8 = vadd.f32 %v994_v5, %v2282_v32  ;;  %v904_v32 = vadd.f32 %v2279_v26, %v2308_v63 }
 0x114   : > { %v1094_v9 = vpop.f32.mrf.mxu0 }
 0x115   : > { %v1044_v12 = vadd.f32 %v1043_v6, %v995_v8  ;;  %v953_v34 = vadd.f32 %v2310_v0, %v904_v32 }
 0x117   : > { %v1143_v10 = vpop.f32.mrf.mxu1  ;;  %v1093_v17 = vadd.f32 %v1092_v3, %v1044_v12 }
 0x119   : > { %v1142_v23 = vadd.f32 %v1141_v4, %v1093_v17 }
 0x11a   : > { %v996_v13 = vpop.f32.mrf.mxu2 }
 0x11b   : > { %v1045_v14 = vpop.f32.mrf.mxu3  ;;  %v997_v16 = vadd.f32 %v996_v13, %v948_v11 }
 0x11c   : > { %v1097_v19 = vpop.f32.mrf.mxu0 }
 0x11d   : > { %v1046_v18 = vadd.f32 %v1045_v14, %v997_v16 }
 0x11f   : > { %v1146_v21 = vpop.f32.mrf.mxu1  ;;  %v1095_v22 = vadd.f32 %v1094_v9, %v1046_v18 }
 0x121   : > { %v1144_v28 = vadd.f32 %v1143_v10, %v1095_v22 }
 0x122   : > { %v999_v29 = vpop.f32.mrf.mxu2 }
 0x123   : > { %v1048_v37 = vpop.f32.mrf.mxu3  ;;  %v1811_v30 = vpack.c.bf16 %v1144_v28, %v1142_v23  ;;  %v1000_v38 = vadd.f32 %v999_v29, %v2303_v58  ;;  %v909_v58 = vadd.f32 %v2279_v26, %v2329_v25 }
 0x124   : > { %v1099_v31 = vpop.f32.mrf.mxu0 }
 0x125   : > { %1812 = vst [vmem:[%s2364_s20] sm:$0xff] %v1811_v30   ;;  %v1049_v35 = vadd.f32 %v1048_v37, %v1000_v38  ;;  %v958_v60 = vadd.f32 %v2331_v27, %v909_v58 }
 0x127   : > { %v1148_v33 = vpop.f32.mrf.mxu1  ;;  %v1098_v42 = vadd.f32 %v1097_v19, %v1049_v35 }
 0x129   : > { %v1147_v47 = vadd.f32 %v1146_v21, %v1098_v42 }
 0x12a   : > { %v1001_v39 = vpop.f32.mrf.mxu2 }
 0x12b   : > { %v1050_v40 = vpop.f32.mrf.mxu3  ;;  %v1002_v41 = vadd.f32 %v1001_v39, %v953_v34 }
 0x12c   : > { %v1102_v44 = vpop.f32.mrf.mxu0 }
 0x12d   : > { %v1051_v43 = vadd.f32 %v1050_v40, %v1002_v41 }
 0x12f   : > { %v1151_v45 = vpop.f32.mrf.mxu1  ;;  %v1100_v63 = vadd.f32 %v1099_v31, %v1051_v43 }
 0x131   : > { %v1149_v48 = vadd.f32 %v1148_v33, %v1100_v63 }
 0x132   : > { %v1004_v49 = vpop.f32.mrf.mxu2 }
 0x133   : > { %v1053_v50 = vpop.f32.mrf.mxu3  ;;  %v1816_v52 = vpack.c.bf16 %v1149_v48, %v1147_v47  ;;  %v1005_v0 = vadd.f32 %v1004_v49, %v2324_v20  ;;  %v914_v20 = vadd.f32 %v2279_v26, %v2350_v57 }
 0x134   : > { %v1104_v54 = vpop.f32.mrf.mxu0 }
 0x135   : > { %1848 = vst [vmem:[%s2364_s20 + $0x8] sm:$0xff] %v1816_v52   ;;  %v1054_v61 = vadd.f32 %v1053_v50, %v1005_v0  ;;  %v963_v17 = vadd.f32 %v2352_v59, %v914_v20 }
 0x137   : > { %v1153_v55 = vpop.f32.mrf.mxu1  ;;  %v1103_v5 = vadd.f32 %v1102_v44, %v1054_v61 }
 0x139   : > { %v1152_v10 = vadd.f32 %v1151_v45, %v1103_v5 }
 0x13a   : > { %v1006_v1 = vpop.f32.mrf.mxu2 }
 0x13b   : > { %v1055_v3 = vpop.f32.mrf.mxu3  ;;  %v1007_v4 = vadd.f32 %v1006_v1, %v958_v60 }
 0x13c   : > { %v1107_v7 = vpop.f32.mrf.mxu0 }
 0x13d   : > { %v1056_v6 = vadd.f32 %v1055_v3, %v1007_v4 }
 0x13f   : > { %v1156_v8 = vpop.f32.mrf.mxu1  ;;  %v1105_v9 = vadd.f32 %v1104_v54, %v1056_v6 }
 0x141   : > { %v1154_v11 = vadd.f32 %v1153_v55, %v1105_v9 }
 0x142   : > { %v1009_v25 = vpop.f32.mrf.mxu2 }
 0x143   : > { %v1058_v12 = vpop.f32.mrf.mxu3  ;;  %v1821_v13 = vpack.c.bf16 %v1154_v11, %v1152_v10  ;;  %v1010_v27 = vadd.f32 %v1009_v25, %v2345_v51 }
 0x144   : > { %v1109_v14 = vpop.f32.mrf.mxu0 }
 0x145   : > { %1849 = vst [vmem:[%s2364_s20 + $0x10] sm:$0xff] %v1821_v13   ;;  %v1059_v18 = vadd.f32 %v1058_v12, %v1010_v27 }
 0x147   : > { %v1158_v16 = vpop.f32.mrf.mxu1  ;;  %v1108_v23 = vadd.f32 %v1107_v7, %v1059_v18 }
 0x149   : > { %v1157_v32 = vadd.f32 %v1156_v8, %v1108_v23 }
 0x14a   : > { %v1011_v19 = vpop.f32.mrf.mxu2 }
 0x14b   : > { %v1060_v21 = vpop.f32.mrf.mxu3  ;;  %v1012_v22 = vadd.f32 %v1011_v19, %v963_v17 }
 0x14c   : > { %v1112_v29 = vpop.f32.mrf.mxu0 }
 0x14d   : > { %v1061_v28 = vadd.f32 %v1060_v21, %v1012_v22 }
 0x14f   : > { %v1161_v37 = vpop.f32.mrf.mxu1  ;;  %v1110_v30 = vadd.f32 %v1109_v14, %v1061_v28 }
 0x151   : > { %v1159_v38 = vadd.f32 %v1158_v16, %v1110_v30 }
 0x152   : > { %v1014_v26 = vpop.f32.mrf.mxu2 }
 0x153   : > { %v1063_v57 = vpop.f32.mrf.mxu3  ;;  %v1826_v31 = vpack.c.bf16 %v1159_v38, %v1157_v32  ;;  %v1015_v51 = vadd.f32 %v1014_v26, %v2285_v36 }
 0x154   : > { %v1114_v33 = vpop.f32.mrf.mxu0 }
 0x155   : > { %1850 = vst [vmem:[%s2364_s20 + $0x18] sm:$0xff] %v1826_v31   ;;  %v1064_v34 = vadd.f32 %v1063_v57, %v1015_v51 }
 0x157   : > { %v1163_v59 = vpop.f32.mrf.mxu1  ;;  %v1113_v41 = vadd.f32 %v1112_v29, %v1064_v34 }
 0x159   : > { %v1162_v63 = vadd.f32 %v1161_v37, %v1113_v41 }
 0x15a   : > { %v1016_v35 = vpop.f32.mrf.mxu2 }
 0x15b   : > { %v1065_v39 = vpop.f32.mrf.mxu3  ;;  %v1017_v40 = vadd.f32 %v1016_v35, %v2300_v53 }
 0x15c   : > { %v1117_v43 = vpop.f32.mrf.mxu0 }
 0x15d   : > { %v1066_v42 = vadd.f32 %v1065_v39, %v1017_v40 }
 0x15f   : > { %v1166_v44 = vpop.f32.mrf.mxu1  ;;  %v1115_v45 = vadd.f32 %v1114_v33, %v1066_v42 }
 0x161   : > { %v1164_v47 = vadd.f32 %v1163_v59, %v1115_v45 }
 0x162   : > { %v1019_v48 = vpop.f32.mrf.mxu2 }
 0x163   : > { %v1068_v49 = vpop.f32.mrf.mxu3  ;;  %v1831_v50 = vpack.c.bf16 %v1164_v47, %v1162_v63  ;;  %v1020_v36 = vadd.f32 %v1019_v48, %v2306_v62 }
 0x164   : > { %v1119_v52 = vpop.f32.mrf.mxu0 }
 0x165   : > { %1851 = vst [vmem:[%s2364_s20 + $0x20] sm:$0xff] %v1831_v50   ;;  %v1069_v0 = vadd.f32 %v1068_v49, %v1020_v36 }
 0x167   : > { %v1168_v58 = vpop.f32.mrf.mxu1  ;;  %v1118_v60 = vadd.f32 %v1117_v43, %v1069_v0 }
 0x169   : > { %v1167_v4 = vadd.f32 %v1166_v44, %v1118_v60 }
 0x16a   : > { %v1021_v54 = vpop.f32.mrf.mxu2 }
 0x16b   : > { %v1070_v55 = vpop.f32.mrf.mxu3  ;;  %v1022_v53 = vadd.f32 %v1021_v54, %v2321_v15 }
 0x16c   : > { %v1122_v3 = vpop.f32.mrf.mxu0 }
 0x16d   : > { %v1071_v61 = vadd.f32 %v1070_v55, %v1022_v53 }
 0x16f   : > { %v1120_v1 = vadd.f32 %v1119_v52, %v1071_v61  ;;  %v1171_v6 = vpop.f32.mrf.mxu1 }
 0x171   : > { %v1169_v5 = vadd.f32 %v1168_v58, %v1120_v1 }
 0x172   : > { %v1024_v7 = vpop.f32.mrf.mxu2 }
 0x173   : > { %v1073_v8 = vpop.f32.mrf.mxu3  ;;  %v1836_v9 = vpack.c.bf16 %v1169_v5, %v1167_v4  ;;  %v1025_v62 = vadd.f32 %v1024_v7, %v2327_v24 }
 0x174   : > { %v1124_v11 = vpop.f32.mrf.mxu0 }
 0x175   : > { %1852 = vst [vmem:[%s2364_s20 + $0x28] sm:$0xff] %v1836_v9   ;;  %v1074_v10 = vadd.f32 %v1073_v8, %v1025_v62 }
 0x177   : > { %v1173_v13 = vpop.f32.mrf.mxu1  ;;  %v1123_v20 = vadd.f32 %v1122_v3, %v1074_v10 }
 0x179   : > { %v1172_v16 = vadd.f32 %v1171_v6, %v1123_v20 }
 0x17a   : > { %v1026_v25 = vpop.f32.mrf.mxu2 }
 0x17b   : > { %v1075_v12 = vpop.f32.mrf.mxu3  ;;  %v1027_v15 = vadd.f32 %v1026_v25, %v2342_v46 }
 0x17c   : > { %v1127_v22 = vpop.f32.mrf.mxu0 }
 0x17d   : > { %v1076_v27 = vadd.f32 %v1075_v12, %v1027_v15 }
 0x17f   : > { %v1125_v14 = vadd.f32 %v1124_v11, %v1076_v27  ;;  %v1176_v23 = vpop.f32.mrf.mxu1 }
 0x181   : > { %v1174_v17 = vadd.f32 %v1173_v13, %v1125_v14 }
 0x182   : > { %v1029_v18 = vpop.f32.mrf.mxu2 }
 0x183   : > { %v1078_v19 = vpop.f32.mrf.mxu3  ;;  %v1841_v21 = vpack.c.bf16 %v1174_v17, %v1172_v16  ;;  %v1030_v24 = vadd.f32 %v1029_v18, %v2348_v56 }
 0x184   : > { %v1129_v38 = vpop.f32.mrf.mxu0 }
 0x185   : > { %1853 = vst [vmem:[%s2364_s20 + $0x30] sm:$0xff] %v1841_v21   ;;  %v1079_v28 = vadd.f32 %v1078_v19, %v1030_v24 }
 0x187   : > { %v1128_v30 = vadd.f32 %v1127_v22, %v1079_v28  ;;  %v1178_v56 = vpop.f32.mrf.mxu1 }
 0x189   : > { %v1177_v57 = vadd.f32 %v1176_v23, %v1128_v30 }
 0x18a   : > { %v1031_v29 = vpop.f32.mrf.mxu2 }
 0x18b   : > { %v1032_v46 = vadd.f32 %v1031_v29, %v2355_v2  ;;  %v1080_v37 = vpop.f32.mrf.mxu3 }
 0x18d   : > { %v1081_v32 = vadd.f32 %v1080_v37, %v1032_v46 }
 0x18f   : > { %v1130_v26 = vadd.f32 %v1129_v38, %v1081_v32 }
 0x191   : > { %v1179_v31 = vadd.f32 %v1178_v56, %v1130_v26 }
 0x193   : > { %v1846_v51 = vpack.c.bf16 %v1179_v31, %v1177_v57 }
 0x195   : > { %1854 = vst [vmem:[%s2364_s20 + $0x38] sm:$0xff] %v1846_v51  }
 0x196   : > { %2025 = shalt.err (!%p2022_p10)
}
 0x197   : > { %s2075_s10 = smov 64   ;;  %s2076_s18 = smov 4  }
 0x198   : > { %1880 = dma.vmem_to_hbm [thread:$0]  (%p2164_p7), %s1227_s29, 1024, %s1229_s30, %s1214_s16, %s2075_s10, %s2075_s10, %s2076_s18  }
 0x199 PF: > { %s1243_s23 = sand.u32 1, %s2056_s12   ;;  %p2435_p12 = scmp.ge.s32.totalorder %s2068_s15, 2 }
 0x19a   : > { %s1244_s17 = scalar_lea.sflag [#allocation4], %s1243_s23 }
 0x19b   : > { %p1891_p13 = pnand %p2435_p12, %p2132_p6 }
 0x19d   : > { %p1892_p0 = pneg %p1891_p13 }
 0x19f   : > { %2051 = dma.done.wait (%p1892_p0), %s1244_s17, 1024  }
 0x1a0   : > { %2053 = vsyncadd (%p1892_p0), %s1244_s17, 4294966272  ;;  %p17_p3 = scmp.ge.s32.totalorder %s2150_s26, 4   ;;  %s2436_s12 = smov %s2060_s13 }
 0x1a1   : > { %s2437_s13 = smov %s2064_s14  ;;  %s2438_s14 = smov %s2160_s4 }
 0x1a2   : > { %s2439_s15 = smov %s2150_s26  ;;  %19 = sbr.rel (!%p17_p3) target bundleno = 6 (0x6), region = 81 }
 0x1a7   :  { %1250 = vsyncpa [#allocation3], 1 }
 0x1a8   :  { %1252 = vsyncpa [#allocation3 + $0x1], 1 }
 0x1a9   :  { %1253 = vsyncpa [#allocation6], 1 }
 0x1aa   :  { %1254 = vsyncpa [#allocation4], 1 }
 0x1ab   :  { %1256 = vsyncpa [#allocation4 + $0x1], 1 }

</bundles_post_ra>
